<compile_context>
chip_gen: v7x
topology: tpu7x:2x2x1
jax: 0.10.0
libtpu: 0.0.40
codegen_flags: <defaults>
</compile_context>

<pallas_src>
import math

import jax
import jax.numpy as jnp
from jax.experimental import pallas as pl
from jax.experimental.pallas import tpu as pltpu


def _copy_kernel(x_ref, o_ref):
    # Unsqueeze has no arithmetic; the kernel body is a full-tile VMEM copy.
    o_ref[...] = x_ref[...]


_MAX_LANE_WIDTH = 32768                 # cols cap (multiple of 128)
_TILE_BYTES_BUDGET = 2 * 1024 * 1024    # per-block bytes; x2 dbl-buf x in/out <= 8 MiB VMEM


def _lane_dense_cols(total):
    """Largest multiple-of-128 divisor of `total`, capped at _MAX_LANE_WIDTH."""
    if total <= 0 or total % 128 != 0:
        return None
    max_k = min(total // 128, _MAX_LANE_WIDTH // 128)
    for k in range(max_k, 0, -1):
        if total % (128 * k) == 0:
            return 128 * k
    return None


def _row_alignment(dtype):
    # Keep sublane packing aligned for sub-32-bit dtypes (bf16 -> 16, int8/fp8 -> 32).
    itemsize = jnp.dtype(dtype).itemsize
    if itemsize >= 4:
        return 8
    if itemsize == 2:
        return 16
    return 32


def _pallas_identity_copy(x):
    """Identity copy of `x` through a row-tiled, lane-dense Pallas pipeline.

    Returns an array with the same shape/dtype/values as `x`.  Falls back to
    returning `x` untouched (still exactly correct -- the op is the identity)
    when the element count has no multiple-of-128 factorization.
    """
    total = math.prod(x.shape)
    cols = _lane_dense_cols(total)
    if cols is None:
        # TODO(synk): no lane-dense 2D view (total not a multiple of 128);
        # skip the materializing copy -- metadata-only identity is exact.
        return x

    rows = total // cols
    align = _row_alignment(x.dtype)
    bytes_per_row = cols * jnp.dtype(x.dtype).itemsize
    tile_rows = max(1, _TILE_BYTES_BUDGET // bytes_per_row)
    if tile_rows >= rows:
        tile_rows = rows                          # full dim: always legal
    else:
        tile_rows = max(align, (tile_rows // align) * align)
        tile_rows = min(tile_rows, rows)

    x2d = x.reshape(rows, cols)
    grid = (pl.cdiv(rows, tile_rows),)

    y2d = pl.pallas_call(
        _copy_kernel,
        out_shape=jax.ShapeDtypeStruct((rows, cols), x.dtype),
        grid=grid,
        in_specs=[pl.BlockSpec((tile_rows, cols), lambda i: (i, 0))],
        out_specs=pl.BlockSpec((tile_rows, cols), lambda i: (i, 0)),
        # If the caller donates the input buffer, no writeback DMA is emitted.
        input_output_aliases={0: 0},
        compiler_params=pltpu.CompilerParams(
            dimension_semantics=("parallel",),
        ),
    )(x2d)
    return y2d.reshape(x.shape)


class Unsqueeze:
    """JAX/Pallas mirror of the PyTorch Unsqueeze module."""

    def __init__(self, axis=1):
        self.axis = axis

    def _expand(self, x):
        # Matches torch.unsqueeze semantics, including negative and tuple axes
        # (tuple applied sequentially, each relative to the current rank).
        if isinstance(self.axis, int):
            return jnp.expand_dims(x, self.axis)
        elif isinstance(self.axis, tuple):
            for a in self.axis:
                x = jnp.expand_dims(x, a)
            return x
        else:
            raise TypeError("Invalid axis type.")

    def forward(self, x, materialize=False):
        # Default: zero-cost metadata-only path (recommended).
        # materialize=True routes the data through the Pallas identity copy
        # (fresh buffer), using the tiled/pipelined/lane-dense kernel.
        if materialize:
            x = _pallas_identity_copy(x)
        return self._expand(x)

    def reverse(self, x):
        if isinstance(self.axis, int):
            return jnp.squeeze(x, axis=self.axis)
        elif isinstance(self.axis, tuple):
            for a in self.axis:
                x = jnp.squeeze(x, axis=a)
            return x
        else:
            raise TypeError("Invalid axis type.")

    def logdet(self, x):
        return 0.0

    __call__ = forward


if __name__ == "__main__":
    key = jax.random.PRNGKey(0)
    # Small NCHW-like input: batch=2, channels=4, spatial=16x16.
    x = jax.random.normal(key, (2, 4, 16, 16), dtype=jnp.float32)
    ref = jnp.expand_dims(x, 1)

    mod = Unsqueeze(axis=1)

    # Default path: pure shape metadata, zero data movement, no kernel.
    y_meta = jax.block_until_ready(mod(x))
    assert y_meta.shape == (2, 1, 4, 16, 16), y_meta.shape
    assert y_meta.dtype == x.dtype
    assert bool(jnp.array_equal(y_meta, ref))

    # Pallas path: run the identity-copy kernel once and block on the result.
    y = jax.block_until_ready(mod.forward(x, materialize=True))
    assert y.shape == (2, 1, 4, 16, 16), y.shape
    assert y.dtype == x.dtype
    assert bool(jnp.array_equal(y, ref))

    # Exercise the multi-tile (grid > 1) pipelined path with a sub-32-bit dtype.
    xb = jax.random.normal(jax.random.PRNGKey(0), (8, 32, 64, 128), dtype=jnp.bfloat16)
    yb = jax.block_until_ready(Unsqueeze(axis=-1).forward(xb, materialize=True))
    assert yb.shape == (8, 32, 64, 128, 1)
    assert bool(jnp.array_equal(yb, jnp.expand_dims(xb, -1)))

    # Tuple-axis path, reverse() and logdet().
    mod_t = Unsqueeze(axis=(0, 2))
    yt = jax.block_until_ready(mod_t.forward(x, materialize=True))
    ref_t = jnp.expand_dims(jnp.expand_dims(x, 0), 2)
    assert yt.shape == ref_t.shape and bool(jnp.array_equal(yt, ref_t))
    assert bool(jnp.array_equal(mod.reverse(y), x))
    assert mod.logdet(x) == 0.0

    print("KERNEL_OK")
</pallas_src>

<mosaic_0001>
module attributes {stable_mosaic.version = 11 : i64} {
  func.func @_copy_kernel(%arg0: i32, %arg1: memref<1x2048xf32, #tpu.memory_space<vmem>>, %arg2: memref<1x2048xf32, #tpu.memory_space<vmem>>) attributes {dimension_semantics = [#tpu.dimension_semantics<parallel>], iteration_bounds = array<i64: 1>, scalar_prefetch = 0 : i64, scratch_operands = 0 : i64, tpu.core_type = #tpu.core_type<tc>, window_params = [{transform_indices = @transform_0, window_bounds = array<i64: 1, 2048>}, {transform_indices = @transform_1, window_bounds = array<i64: 1, 2048>}]} {
    %c0 = arith.constant 0 : index
    %c0_0 = arith.constant 0 : index
    %0 = vector.load %arg1[%c0, %c0_0] : memref<1x2048xf32, #tpu.memory_space<vmem>>, vector<1x2048xf32>
    %c0_1 = arith.constant 0 : index
    %c0_2 = arith.constant 0 : index
    %1 = vector.load %arg2[%c0_1, %c0_2] : memref<1x2048xf32, #tpu.memory_space<vmem>>, vector<1x2048xf32>
    tpu.vector_store %arg2[%c0_1, %c0_2], %0 {strides = array<i32>} : memref<1x2048xf32, #tpu.memory_space<vmem>>, vector<1x2048xf32>,
    return
  }
  func.func @transform_0(%arg0: i32) -> (i32, i32) {
    %c0_i32 = arith.constant 0 : i32
    %c0_i32_0 = arith.constant 0 : i32
    return %arg0, %c0_i32 : i32, i32
  }
  func.func @transform_1(%arg0: i32) -> (i32, i32) {
    %c0_i32 = arith.constant 0 : i32
    %c0_i32_0 = arith.constant 0 : i32
    return %arg0, %c0_i32 : i32, i32
  }
}

</mosaic_0001>

<bundles_post_ra>
// kernel: tpu_custom_call.1
= control target key start
LH: loop header
LB: loop body
LE: loop exit
PB: predicated region body
PF: predicated region fallthrough
CT: control target
= control target key end

     0   :  { %6 = vsyncpa [#allocation3], 0  ;;  %s126_s0 = inlined_call_operand.hbm [shape: f32[1,2048], index: 0, kind: input, shape index: {}, may-alias: {0,1}]   ;;  %s127_s1 = inlined_call_operand.hbm [shape: f32[1,2048], index: 1, kind: output, shape index: {}, may-alias: {0,1}]  }
   0x1   :  { %7 = vsyncpa [#allocation4], 0  ;;  %s90_s6 = smov [#allocation2]   ;;  %s42_s10 = scalar_lea.hbm %s126_s0, 256 }
   0x2   :  { %s14_s7 = sshll.u32 %s90_s6, 4  ;;  %p43_p0 = scmp.ne.s32.totalorder %s126_s0, %s42_s10  ;;  %s15_s7 = int_to_ptr.vmem [resolvable:$true] %s14_s7 }
   0x3   :  { %p46_p1 = scmp.lt.u32.totalorder %s42_s10, %s126_s0 }
   0x5   :  { %p48_p2 = pnand %p46_p1, %p43_p0 }
   0x7   :  { %51 = shalt.err (!%p48_p2)
}
   0x8   :  { %s52_s15 = scalar_lea.vmem %s15_s7, 256  ;;  %p57_p4 = scmp.lt.s32.totalorder %s15_s7, %s15_s7 }
   0x9   :  { %p53_p3 = scmp.ne.s32.totalorder %s15_s7, %s52_s15  ;;  %p58_p5 = scmp.lt.s32.totalorder %s52_s15, %s52_s15 }
   0xb   :  { %p59_p6 = por %p58_p5, %p57_p4 }
   0xd   :  { %p60_p7 = pnand %p59_p6, %p53_p3 }
   0xf   :  { %63 = shalt.err (!%p60_p7)
}
  0x10   :  { %17 = dma.hbm_to_vmem [thread:$0]  %s126_s0, 256, %s15_s7, [#allocation3]  }
  0x11   :  { %86 = dma.done.wait [#allocation3], 256  }
  0x12   :  { %87 = vsyncadd [#allocation3], 4294967040  ;;  %s91_s18 = smov [#allocation5]   ;;  %v21_v0 = vld [vmem:[#allocation2] sm:$0xff]  ;;  %v22_v1 = vld [vmem:[#allocation2 + $0x8] sm:$0xff] }
  0x13   :  { %s31_s19 = sshll.u32 %s91_s18, 4  ;;  %23 = vst [vmem:[#allocation5] sm:$0xff] %v21_v0  ;;  %24 = vst [vmem:[#allocation5 + $0x8] sm:$0xff] %v22_v1  ;;  %s32_s19 = int_to_ptr.vmem [resolvable:$true] %s31_s19 }
  0x14   :  { %s64_s20 = scalar_lea.vmem %s32_s19, 256  ;;  %p69_p9 = scmp.lt.s32.totalorder %s32_s19, %s32_s19 }
  0x15   :  { %p65_p8 = scmp.ne.s32.totalorder %s32_s19, %s64_s20  ;;  %p70_p10 = scmp.lt.s32.totalorder %s64_s20, %s64_s20 }
  0x17   :  { %p71_p11 = por %p70_p10, %p69_p9 }
  0x19   :  { %p72_p12 = pnand %p71_p11, %p65_p8 }
  0x1b   :  { %75 = shalt.err (!%p72_p12)
}
  0x1c   :  { %s76_s0 = scalar_lea.hbm %s127_s1, 256 }
  0x1d   :  { %p77_p13 = scmp.ne.s32.totalorder %s127_s1, %s76_s0  ;;  %p80_p0 = scmp.lt.u32.totalorder %s76_s0, %s127_s1 }
  0x1f   :  { %p82_p1 = pnand %p80_p0, %p77_p13 }
  0x21   :  { %85 = shalt.err (!%p82_p1)
}
  0x22   :  { %34 = dma.vmem_to_hbm [thread:$0]  %s32_s19, 256, %s127_s1, [#allocation4]  }
  0x23   :  { %88 = dma.done.wait [#allocation4], 256  }
  0x24   :  { %89 = vsyncadd [#allocation4], 4294967040 }
  0x25   :  { %38 = vsyncpa [#allocation3], 1 }
  0x26   :  { %39 = vsyncpa [#allocation4], 1 }

</bundles_post_ra>
